<compile_context>
chip_gen: v7x
topology: tpu7x:2x2x1
jax: 0.10.0
libtpu: 0.0.40
codegen_flags: <defaults>
</compile_context>

<pallas_src>
import functools

import jax
import jax.numpy as jnp
from jax import lax
from jax.experimental import pallas as pl
from jax.experimental.pallas import tpu as pltpu


_LANES = 128
_ACC_ROWS = 64                          # accumulator height: 8 f32 vregs of ILP
_MAX_TILE_BYTES = 2 * 1024 * 1024       # per-input per-block VMEM footprint
_VMEM_LIMIT_BYTES = 32 * 1024 * 1024    # explicit; safe on v5e/v6e/v7x


def _round_up(x, m):
    return ((x + m - 1) // m) * m


def _sq_diff_kernel(s_ref, t_ref, o_ref, *, rows_total, tile_rows, half_blocks):
    """Accumulate sum((s - t)^2) into a lane-dense (ACC_ROWS, 128) f32
    accumulator that lives in this slot's resident output block."""
    c = pl.program_id(0)   # partial-sum slot ("parallel"; per-TC on megacore)
    i = pl.program_id(1)   # block index within this slot ("arbitrary")

    @pl.when(i == 0)
    def _():
        o_ref[...] = jnp.zeros_like(o_ref)

    linear_block = c * half_blocks + i
    start_row = linear_block * tile_rows
    folds = tile_rows // _ACC_ROWS

    def _fold(d2):
        return jnp.sum(d2.reshape(folds, _ACC_ROWS, _LANES), axis=0)

    is_full = start_row + tile_rows <= rows_total

    # Common path: interior block, no masking -> just sub, mul, accumulate.
    @pl.when(is_full)
    def _():
        d = s_ref[...].astype(jnp.float32) - t_ref[...].astype(jnp.float32)
        o_ref[0] += _fold(d * d)

    # Rare path (at most one block per slot): tail or clamped-duplicate block.
    @pl.when(jnp.logical_not(is_full))
    def _():
        row_ids = lax.broadcasted_iota(jnp.int32, (tile_rows, _LANES), 0)
        mask = (start_row + row_ids) < rows_total
        d = s_ref[...].astype(jnp.float32) - t_ref[...].astype(jnp.float32)
        o_ref[0] += _fold(jnp.where(mask, d * d, 0.0))


def _pallas_sum_sq_diff(s2, t2):
    """s2, t2: (R, 128) arrays (any float dtype).  Returns f32 sum((s - t)^2)."""
    R, L = s2.shape
    assert L == _LANES
    itemsize = jnp.dtype(s2.dtype).itemsize

    # Largest block that keeps 2 inputs x 2 pipeline buffers (plus elementwise
    # temporaries) well under the scoped-VMEM limit on every generation.
    # Rows are rounded to _ACC_ROWS, which is a multiple of every dtype's
    # sublane packing (8 f32 / 16 bf16 / 32 int8).
    max_rows = max(
        _ACC_ROWS,
        (_MAX_TILE_BYTES // (_LANES * itemsize)) // _ACC_ROWS * _ACC_ROWS)
    tile_rows = min(max_rows, _round_up(R, _ACC_ROWS))
    total_blocks = (R + tile_rows - 1) // tile_rows
    half_blocks = (total_blocks + 1) // 2  # blocks per parallel slot

    def in_map(c, i):
        # Clamp so the DMA never starts past the end of the array; the
        # in-kernel row mask zeroes any duplicate/partial contribution.
        return (jnp.minimum(c * half_blocks + i, total_blocks - 1), 0)

    kernel = functools.partial(
        _sq_diff_kernel,
        rows_total=R, tile_rows=tile_rows, half_blocks=half_blocks)

    # TODO(synk): on v7x, verify the size-2 "parallel" axis actually shards
    # across both TensorCores; if not, switch it to pltpu.CORE_PARALLEL.
    partials = pl.pallas_call(
        kernel,
        out_shape=jax.ShapeDtypeStruct((2, _ACC_ROWS, _LANES), jnp.float32),
        grid_spec=pltpu.PrefetchScalarGridSpec(
            num_scalar_prefetch=0,
            grid=(2, half_blocks),
            in_specs=[
                pl.BlockSpec((tile_rows, _LANES), in_map),
                pl.BlockSpec((tile_rows, _LANES), in_map),
            ],
            out_specs=pl.BlockSpec((1, _ACC_ROWS, _LANES),
                                   lambda c, i: (c, 0, 0)),
        ),
        compiler_params=pltpu.CompilerParams(
            dimension_semantics=("parallel", "arbitrary"),
            vmem_limit_bytes=_VMEM_LIMIT_BYTES,
        ),
    )(s2, t2)
    # Final reduction of the two lane-dense slot accumulators in plain JAX
    # (removes the in-kernel XLU reduce and the masked sub-128-lane store).
    return jnp.sum(partials, dtype=jnp.float32)


@jax.jit
def _feature_mse(s, t):
    n = s.size
    flat_s = s.reshape(-1)
    flat_t = t.reshape(-1)
    main = (n // _LANES) * _LANES

    ssq = jnp.float32(0.0)
    if main > 0:
        # No jnp.pad of the full tensors: if n is 128-divisible this is a free
        # reshape; otherwise only the <128-element tail is handled below.
        # TODO(synk): when n % 128 != 0 the prefix slice still materializes an
        # XLA copy; element-granular masking of an un-reshaped 1-D input would
        # avoid it entirely.
        ssq = _pallas_sum_sq_diff(
            flat_s[:main].reshape(main // _LANES, _LANES),
            flat_t[:main].reshape(main // _LANES, _LANES))

    rem = n - main
    if rem:
        dt = flat_s[main:].astype(jnp.float32) - flat_t[main:].astype(jnp.float32)
        ssq = ssq + jnp.sum(dt * dt)

    return ssq / jnp.float32(n)


class BaseDistiller:
    """JAX/Pallas port of the PyTorch BaseDistiller."""

    def forward(self, student_outputs, teacher_meta):
        losses, meta = self.distill(student_outputs, teacher_meta)
        return (losses, meta)

    def __call__(self, student_outputs, teacher_meta):
        return self.forward(student_outputs, teacher_meta)

    def distill(self, student_outputs, teacher_meta):
        # TODO(synk): BaseDistiller.distill raises NotImplementedError in the
        # reference; the MSE feature-distillation below is a representative
        # concrete instantiation so there is a real hot path to kernelize.
        s = student_outputs["features"]
        t = teacher_meta["features"]
        assert s.shape == t.shape, (s.shape, t.shape)

        mse = _feature_mse(s, t)
        losses = {"distill_mse": mse}
        meta = {"teacher_meta": teacher_meta}
        return losses, meta


if __name__ == "__main__":
    key = jax.random.PRNGKey(0)
    k_s, k_t = jax.random.split(key)

    # Small shapes consistent with a feature-distillation forward: NCHW.
    B, C, H, W = 2, 4, 16, 16
    student_feat = jax.random.normal(k_s, (B, C, H, W), dtype=jnp.float32)
    teacher_feat = jax.random.normal(k_t, (B, C, H, W), dtype=jnp.float32)

    student_outputs = {"features": student_feat}
    teacher_meta = {"features": teacher_feat}

    distiller = BaseDistiller()
    losses, meta = distiller(student_outputs, teacher_meta)
    jax.block_until_ready(losses["distill_mse"])

    # Reference check (plain JAX).
    ref = jnp.mean((student_feat - teacher_feat) ** 2)
    assert jnp.allclose(losses["distill_mse"], ref, rtol=1e-5, atol=1e-6), (
        losses["distill_mse"], ref)

    print("KERNEL_OK")
</pallas_src>

<mosaic_0001>
module attributes {stable_mosaic.version = 11 : i64} {
  func.func @_sq_diff_kernel(%arg0: i32, %arg1: i32, %arg2: memref<64x128xf32, #tpu.memory_space<vmem>>, %arg3: memref<64x128xf32, #tpu.memory_space<vmem>>, %arg4: memref<1x64x128xf32, #tpu.memory_space<vmem>>) attributes {dimension_semantics = [#tpu.dimension_semantics<parallel>, #tpu.dimension_semantics<arbitrary>], iteration_bounds = array<i64: 2, 1>, scalar_prefetch = 0 : i64, scratch_operands = 0 : i64, tpu.core_type = #tpu.core_type<tc>, window_params = [{transform_indices = @transform_0, window_bounds = array<i64: 64, 128>}, {transform_indices = @transform_1, window_bounds = array<i64: 64, 128>}, {transform_indices = @transform_2, window_bounds = array<i64: 1, 64, 128>}]} {
    %c0_i32 = arith.constant 0 : i32
    %0 = arith.cmpi eq, %arg1, %c0_i32 : i32
    %1 = arith.extui %0 : i1 to i32
    %c0_i32_0 = arith.constant 0 : i32
    %2 = arith.cmpi ne, %1, %c0_i32_0 : i32
    scf.if %2 {
      %cst = arith.constant 0.000000e+00 : f32
      %13 = vector.broadcast %cst : f32 to vector<1x64x128xf32>
      %c0 = arith.constant 0 : index
      %c0_4 = arith.constant 0 : index
      %c0_5 = arith.constant 0 : index
      %14 = vector.load %arg4[%c0, %c0_4, %c0_5] : memref<1x64x128xf32, #tpu.memory_space<vmem>>, vector<1x64x128xf32>
      tpu.vector_store %arg4[%c0, %c0_4, %c0_5], %13 {strides = array<i32>} : memref<1x64x128xf32, #tpu.memory_space<vmem>>, vector<1x64x128xf32>,
    } else {
    }
    %c1_i32 = arith.constant 1 : i32
    %3 = arith.muli %arg0, %c1_i32 : i32
    %4 = arith.addi %3, %arg1 : i32
    %c64_i32 = arith.constant 64 : i32
    %5 = arith.muli %4, %c64_i32 : i32
    %c64_i32_1 = arith.constant 64 : i32
    %6 = arith.addi %5, %c64_i32_1 : i32
    %c16_i32 = arith.constant 16 : i32
    %7 = arith.cmpi sle, %6, %c16_i32 : i32
    %8 = arith.extui %7 : i1 to i32
    %c0_i32_2 = arith.constant 0 : i32
    %9 = arith.cmpi ne, %8, %c0_i32_2 : i32
    scf.if %9 {
      %c0 = arith.constant 0 : index
      %c0_4 = arith.constant 0 : index
      %13 = vector.load %arg2[%c0, %c0_4] : memref<64x128xf32, #tpu.memory_space<vmem>>, vector<64x128xf32>
      %c0_5 = arith.constant 0 : index
      %c0_6 = arith.constant 0 : index
      %14 = vector.load %arg3[%c0_5, %c0_6] : memref<64x128xf32, #tpu.memory_space<vmem>>, vector<64x128xf32>
      %15 = arith.subf %13, %14 : vector<64x128xf32>
      %c0_7 = arith.constant 0 : index
      %c0_8 = arith.constant 0 : index
      %c0_9 = arith.constant 0 : index
      %16 = vector.load %arg4[%c0_7, %c0_8, %c0_9] : memref<1x64x128xf32, #tpu.memory_space<vmem>>, vector<1x64x128xf32>
      %17 = vector.shape_cast %16 : vector<1x64x128xf32> to vector<64x128xf32>
      %18 = arith.mulf %15, %15 : vector<64x128xf32>
      %19 = vector.shape_cast %18 : vector<64x128xf32> to vector<1x64x128xf32>
      %cst = arith.constant dense<0.000000e+00> : vector<64x128xf32>
      %20 = vector.multi_reduction <add>, %19, %cst [0] : vector<1x64x128xf32> to vector<64x128xf32>
      %21 = arith.addf %17, %20 : vector<64x128xf32>
      %c0_10 = arith.constant 0 : index
      %c0_11 = arith.constant 0 : index
      %c0_12 = arith.constant 0 : index
      %22 = vector.load %arg4[%c0_10, %c0_11, %c0_12] : memref<1x64x128xf32, #tpu.memory_space<vmem>>, vector<1x64x128xf32>
      %23 = vector.shape_cast %22 : vector<1x64x128xf32> to vector<64x128xf32>
      %24 = vector.shape_cast %21 : vector<64x128xf32> to vector<1x64x128xf32>
      tpu.vector_store %arg4[%c0_10, %c0_11, %c0_12], %24 {strides = array<i32>} : memref<1x64x128xf32, #tpu.memory_space<vmem>>, vector<1x64x128xf32>,
    } else {
    }
    %true = arith.constant true
    %10 = arith.xori %7, %true : i1
    %11 = arith.extui %10 : i1 to i32
    %c0_i32_3 = arith.constant 0 : i32
    %12 = arith.cmpi ne, %11, %c0_i32_3 : i32
    scf.if %12 {
      %13 = tpu.iota {dimensions = array<i32: 0>} : vector<64x128xi32>
      %14 = vector.broadcast %5 : i32 to vector<64x128xi32>
      %15 = arith.addi %14, %13 : vector<64x128xi32>
      %c16_i32_4 = arith.constant 16 : i32
      %16 = vector.broadcast %c16_i32_4 : i32 to vector<64x128xi32>
      %17 = arith.cmpi slt, %15, %16 : vector<64x128xi32>
      %c0 = arith.constant 0 : index
      %c0_5 = arith.constant 0 : index
      %18 = vector.load %arg2[%c0, %c0_5] : memref<64x128xf32, #tpu.memory_space<vmem>>, vector<64x128xf32>
      %c0_6 = arith.constant 0 : index
      %c0_7 = arith.constant 0 : index
      %19 = vector.load %arg3[%c0_6, %c0_7] : memref<64x128xf32, #tpu.memory_space<vmem>>, vector<64x128xf32>
      %20 = arith.subf %18, %19 : vector<64x128xf32>
      %c0_8 = arith.constant 0 : index
      %c0_9 = arith.constant 0 : index
      %c0_10 = arith.constant 0 : index
      %21 = vector.load %arg4[%c0_8, %c0_9, %c0_10] : memref<1x64x128xf32, #tpu.memory_space<vmem>>, vector<1x64x128xf32>
      %22 = vector.shape_cast %21 : vector<1x64x128xf32> to vector<64x128xf32>
      %23 = arith.mulf %20, %20 : vector<64x128xf32>
      %cst = arith.constant 0.000000e+00 : f32
      %24 = vector.broadcast %cst : f32 to vector<64x128xf32>
      %25 = arith.select %17, %23, %24 : vector<64x128xi1>, vector<64x128xf32>
      %26 = vector.shape_cast %25 : vector<64x128xf32> to vector<1x64x128xf32>
      %cst_11 = arith.constant dense<0.000000e+00> : vector<64x128xf32>
      %27 = vector.multi_reduction <add>, %26, %cst_11 [0] : vector<1x64x128xf32> to vector<64x128xf32>
      %28 = arith.addf %22, %27 : vector<64x128xf32>
      %c0_12 = arith.constant 0 : index
      %c0_13 = arith.constant 0 : index
      %c0_14 = arith.constant 0 : index
      %29 = vector.load %arg4[%c0_12, %c0_13, %c0_14] : memref<1x64x128xf32, #tpu.memory_space<vmem>>, vector<1x64x128xf32>
      %30 = vector.shape_cast %29 : vector<1x64x128xf32> to vector<64x128xf32>
      %31 = vector.shape_cast %28 : vector<64x128xf32> to vector<1x64x128xf32>
      tpu.vector_store %arg4[%c0_12, %c0_13, %c0_14], %31 {strides = array<i32>} : memref<1x64x128xf32, #tpu.memory_space<vmem>>, vector<1x64x128xf32>,
    } else {
    }
    return
  }
  func.func @transform_0(%arg0: i32, %arg1: i32) -> (i32, i32) {
    %c1_i32 = arith.constant 1 : i32
    %0 = arith.muli %arg0, %c1_i32 : i32
    %1 = arith.addi %0, %arg1 : i32
    %c0_i32 = arith.constant 0 : i32
    %2 = arith.minsi %1, %c0_i32 : i32
    %c0_i32_0 = arith.constant 0 : i32
    %c0_i32_1 = arith.constant 0 : i32
    return %2, %c0_i32_0 : i32, i32
  }
  func.func @transform_1(%arg0: i32, %arg1: i32) -> (i32, i32) {
    %c1_i32 = arith.constant 1 : i32
    %0 = arith.muli %arg0, %c1_i32 : i32
    %1 = arith.addi %0, %arg1 : i32
    %c0_i32 = arith.constant 0 : i32
    %2 = arith.minsi %1, %c0_i32 : i32
    %c0_i32_0 = arith.constant 0 : i32
    %c0_i32_1 = arith.constant 0 : i32
    return %2, %c0_i32_0 : i32, i32
  }
  func.func @transform_2(%arg0: i32, %arg1: i32) -> (i32, i32, i32) {
    %c0_i32 = arith.constant 0 : i32
    %c0_i32_0 = arith.constant 0 : i32
    %c0_i32_1 = arith.constant 0 : i32
    return %arg0, %c0_i32, %c0_i32_0 : i32, i32, i32
  }
}

</mosaic_0001>

<bundles_post_ra>
// kernel: _feature_mse.1
= control target key start
LH: loop header
LB: loop body
LE: loop exit
PB: predicated region body
PF: predicated region fallthrough
CT: control target
= control target key end

     0   :  { %s584_s9 = smov 0   ;;  %s586_s10 = smov 0   ;;  %s723_s0 = inlined_call_operand.vmem [shape: f32[16,128], index: 0, kind: input, shape index: {}]   ;;  %s724_s1 = inlined_call_operand.vmem [shape: f32[16,128], index: 1, kind: input, shape index: {}]   ;;  %s725_s2 = inlined_call_operand.vmem [shape: f32[2,64,128], index: 2, kind: output, shape index: {}]  }
   0x1   :  { %s588_s11 = smov 0  }
   0x2 LB: > { %s24_s12 = sadd.s32 1, %s562_s10  ;;  %p506_p0 = scmp.ge.s32.totalorder %s566_s11, 1  ;;  %s566_s11 = sphi %s588_s11, %s12_s11   ;;  %s562_s10 = sphi %s586_s10, %s727_s10   ;;  %s558_s9 = sphi %s584_s9, %s726_s9  }
   0x3   : > { %p26_p1 = scmp.ge.s32.totalorder %s24_s12, 2  ;;  %p168_p2 = scmp.lt.s32.totalorder %s566_s11, 3 }
   0x5   : > { %s729_s12 = smov (%p26_p1, %s24_s12), 0  ;;  %p169_p3 = pnand %p506_p0, %p168_p2 }
   0x6   : > { %p206_p4 = scmp.lt.s32.totalorder (!%p169_p3), %s558_s9, 0  ;;  %p237_p5 = scmp.lt.s32.totalorder (!%p169_p3), %s558_s9, 1  ;;  %v568_v0 = vmov (!%p169_p3), 0.0  }
   0x7   : > { %172 = sbr.rel (%p169_p3) target bundleno = 60 (0x3c), region = 28  ;;  %s513_s13 = sshll.u32 (!%p169_p3), %s558_s9, 6 }
   0x8   : > { %s611_s17 = sadd.s32 (!%p169_p3), 64, %s513_s13 }
   0x9   : > { %p514_p7 = scmp.gt.s32.totalorder (!%p169_p3), %s611_s17, 16 }
   0xe   : > { %s207_s14 = scalar_select %p206_p4, %s558_s9, 0 }
   0xf   : > { %s238_s15 = scalar_select %p237_p5, %s558_s9, 1 }
  0x10   : > { %s507_s16 = sshll.u32 %s207_s14, 3  ;;  %260 = sbr.rel (%p514_p7) target bundleno = 38 (0x26), region = 36 }
  0x11   : > { %p211_p6 = scmp.lt.s32.totalorder %s507_s16, 1  ;;  %s518_s18 = sshll.u32 %s238_s15, 6 }
  0x12   : > { %s616_s21 = scalar_lea.vmem %s725_s2, %s518_s18 }
  0x13   : > { %s731_s16 = smov (!%p211_p6, %s507_s16), 1  ;;  %246 = vst [vmem:[%s616_s21] sm:$0xff] %v568_v0  ;;  %247 = vst [vmem:[%s616_s21 + $0x8] sm:$0xff] %v568_v0 }
  0x14   : > { %248 = vst [vmem:[%s616_s21 + $0x10] sm:$0xff] %v568_v0  ;;  %249 = vst [vmem:[%s616_s21 + $0x18] sm:$0xff] %v568_v0  ;;  %s508_s22 = sshll.u32 %s731_s16, 3 }
  0x15   : > { %250 = vst [vmem:[%s616_s21 + $0x20] sm:$0xff] %v568_v0  ;;  %251 = vst [vmem:[%s616_s21 + $0x28] sm:$0xff] %v568_v0  ;;  %s629_s25 = scalar_lea.vmem %s723_s0, %s508_s22  ;;  %s634_s28 = scalar_lea.vmem %s724_s1, %s508_s22 }
  0x16   : > { %252 = vst [vmem:[%s616_s21 + $0x30] sm:$0xff] %v568_v0  ;;  %253 = vst [vmem:[%s616_s21 + $0x38] sm:$0xff] %v568_v0  ;;  %v261_v1 = vld [vmem:[%s629_s25] sm:$0xff] (!%p514_p7)  ;;  %v262_v4 = vld [vmem:[%s629_s25 + $0x8] sm:$0xff] (!%p514_p7) }
  0x17   : > { %v269_v2 = vld [vmem:[%s634_s28] sm:$0xff]  ;;  %v270_v5 = vld [vmem:[%s634_s28 + $0x8] sm:$0xff]  ;;  %v263_v8 = vld [vmem:[%s629_s25 + $0x10] sm:$0xff] }
  0x18   : > { %v277_v3 = vsub.f32 %v261_v1, %v269_v2  ;;  %v278_v7 = vsub.f32 %v262_v4, %v270_v5  ;;  %v271_v9 = vld [vmem:[%s634_s28 + $0x10] sm:$0xff]  ;;  %v264_v13 = vld [vmem:[%s629_s25 + $0x18] sm:$0xff]  ;;  %v265_v18 = vld [vmem:[%s629_s25 + $0x20] sm:$0xff] }
  0x19   : > { %v279_v12 = vsub.f32 %v263_v8, %v271_v9  ;;  %v272_v14 = vld [vmem:[%s634_s28 + $0x18] sm:$0xff]  ;;  %v273_v19 = vld [vmem:[%s634_s28 + $0x20] sm:$0xff]  ;;  %v266_v24 = vld [vmem:[%s629_s25 + $0x28] sm:$0xff] }
  0x1a   : > { %v285_v6 = vld [vmem:[%s616_s21] sm:$0xff]  ;;  %v293_v10 = vmul.f32 %v277_v3, %v277_v3  ;;  %v286_v11 = vld [vmem:[%s616_s21 + $0x8] sm:$0xff]  ;;  %v294_v15 = vmul.f32 %v278_v7, %v278_v7  ;;  %v280_v17 = vsub.f32 %v264_v13, %v272_v14  ;;  %v281_v23 = vsub.f32 %v265_v18, %v273_v19  ;;  %v267_v30 = vld [vmem:[%s629_s25 + $0x30] sm:$0xff] }
  0x1b   : > { %v287_v16 = vld [vmem:[%s616_s21 + $0x10] sm:$0xff]  ;;  %v295_v21 = vmul.f32 %v279_v12, %v279_v12  ;;  %v288_v22 = vld [vmem:[%s616_s21 + $0x18] sm:$0xff]  ;;  %v274_v25 = vld [vmem:[%s634_s28 + $0x28] sm:$0xff] }
  0x1c   : > { %v309_v20 = vadd.f32 %v293_v10, %v285_v6  ;;  %v310_v26 = vadd.f32 %v294_v15, %v286_v11  ;;  %v296_v27 = vmul.f32 %v280_v17, %v280_v17  ;;  %v289_v28 = vld [vmem:[%s616_s21 + $0x20] sm:$0xff]  ;;  %v282_v29 = vsub.f32 %v266_v24, %v274_v25  ;;  %v275_v31 = vld [vmem:[%s634_s28 + $0x30] sm:$0xff]  ;;  %v290_v34 = vld [vmem:[%s616_s21 + $0x28] sm:$0xff] }
  0x1d   : > { %v311_v32 = vadd.f32 %v295_v21, %v287_v16  ;;  %v297_v33 = vmul.f32 %v281_v23, %v281_v23  ;;  %v283_v35 = vsub.f32 %v267_v30, %v275_v31  ;;  %v268_v36 = vld [vmem:[%s629_s25 + $0x38] sm:$0xff]  ;;  %v291_v40 = vld [vmem:[%s616_s21 + $0x30] sm:$0xff] }
  0x1e   : > { %317 = vst [vmem:[%s616_s21] sm:$0xff] %v309_v20  ;;  %v276_v37 = vld [vmem:[%s634_s28 + $0x38] sm:$0xff]  ;;  %318 = vst [vmem:[%s616_s21 + $0x8] sm:$0xff] %v310_v26  ;;  %v312_v38 = vadd.f32 %v296_v27, %v288_v22  ;;  %v298_v39 = vmul.f32 %v282_v29, %v282_v29 }
  0x1f   : > { %v284_v41 = vsub.f32 %v268_v36, %v276_v37  ;;  %319 = vst [vmem:[%s616_s21 + $0x10] sm:$0xff] %v311_v32  ;;  %v313_v42 = vadd.f32 %v297_v33, %v289_v28  ;;  %v299_v43 = vmul.f32 %v283_v35, %v283_v35  ;;  %v292_v44 = vld [vmem:[%s616_s21 + $0x38] sm:$0xff] }
  0x20   : > { %320 = vst [vmem:[%s616_s21 + $0x18] sm:$0xff] %v312_v38  ;;  %v314_v45 = vadd.f32 %v298_v39, %v290_v34 }
  0x21   : > { %v300_v46 = vmul.f32 %v284_v41, %v284_v41  ;;  %321 = vst [vmem:[%s616_s21 + $0x20] sm:$0xff] %v313_v42  ;;  %v315_v47 = vadd.f32 %v299_v43, %v291_v40 }
  0x22   : > { %322 = vst [vmem:[%s616_s21 + $0x28] sm:$0xff] %v314_v45 }
  0x23   : > { %v316_v48 = vadd.f32 %v300_v46, %v292_v44  ;;  %323 = vst [vmem:[%s616_s21 + $0x30] sm:$0xff] %v315_v47 }
  0x25   : > { %324 = vst [vmem:[%s616_s21 + $0x38] sm:$0xff] %v316_v48 }
  0x26 PF: > { %p515_p8 = scmp.le.s32.totalorder %s611_s17, 16 }
  0x27   : > { %v329_v49 = vlaneseq (!%p515_p8)  ;;  %v355_v50 = vld [vmem:[%s629_s25] sm:$0xff] (!%p515_p8)  ;;  %v674_v52 = vstv (!%p515_p8), %s513_s13  ;;  %v356_v54 = vld [vmem:[%s629_s25 + $0x8] sm:$0xff] (!%p515_p8)  ;;  %v357_v58 = vld [vmem:[%s629_s25 + $0x10] sm:$0xff] (!%p515_p8) }
  0x28   : > { %328 = sbr.rel (%p515_p8) target bundleno = 60 (0x3c), region = 40  ;;  %v363_v51 = vld [vmem:[%s634_s28] sm:$0xff] (!%p515_p8)  ;;  %v364_v55 = vld [vmem:[%s634_s28 + $0x8] sm:$0xff] (!%p515_p8)  ;;  %v365_v59 = vld [vmem:[%s634_s28 + $0x10] sm:$0xff] (!%p515_p8) }
  0x29   : > { %v371_v53 = vsub.f32 (!%p515_p8), %v355_v50, %v363_v51  ;;  %v330_v56 = vshrl.u32 (!%p515_p8), %v329_v49, 7  ;;  %v372_v57 = vsub.f32 (!%p515_p8), %v356_v54, %v364_v55  ;;  %v373_v61 = vsub.f32 (!%p515_p8), %v357_v58, %v365_v59  ;;  %v358_v62 = vld [vmem:[%s629_s25 + $0x18] sm:$0xff] (!%p515_p8)  ;;  %v359_v4 = vld [vmem:[%s629_s25 + $0x20] sm:$0xff] (!%p515_p8)  ;;  %v380_v12 = vld [vmem:[%s616_s21 + $0x8] sm:$0xff] (!%p515_p8) }
  0x2a   : > { %v366_v63 = vld [vmem:[%s634_s28 + $0x18] sm:$0xff] (!%p515_p8)  ;;  %v367_v5 = vld [vmem:[%s634_s28 + $0x20] sm:$0xff] (!%p515_p8)  ;;  %v381_v14 = vld [vmem:[%s616_s21 + $0x10] sm:$0xff] (!%p515_p8) }
  0x2b   : > { %v387_v60 = vmul.f32 (!%p515_p8), %v371_v53, %v371_v53  ;;  %v339_v0 = vadd.s32 (!%p515_p8), %v674_v52, %v330_v56  ;;  %v331_v1 = vadd.s32 (!%p515_p8), 8, %v330_v56  ;;  %v388_v2 = vmul.f32 (!%p515_p8), %v372_v57, %v372_v57  ;;  %v379_v6 = vld [vmem:[%s616_s21] sm:$0xff] (!%p515_p8)  ;;  %v382_v18 = vld [vmem:[%s616_s21 + $0x18] sm:$0xff] (!%p515_p8)  ;;  %v360_v22 = vld [vmem:[%s629_s25 + $0x28] sm:$0xff] (!%p515_p8) }
  0x2c   : > { %v332_v3 = vadd.s32 (!%p515_p8), 16, %v330_v56  ;;  %v389_v7 = vmul.f32 (!%p515_p8), %v373_v61, %v373_v61  ;;  %v333_v8 = vadd.s32 (!%p515_p8), 24, %v330_v56  ;;  %v374_v9 = vsub.f32 (!%p515_p8), %v358_v62, %v366_v63  ;;  %v383_v21 = vld [vmem:[%s616_s21 + $0x20] sm:$0xff] (!%p515_p8)  ;;  %v368_v25 = vld [vmem:[%s634_s28 + $0x28] sm:$0xff] (!%p515_p8)  ;;  %v361_v26 = vld [vmem:[%s629_s25 + $0x30] sm:$0xff] (!%p515_p8) }
  0x2d   : > { %v334_v10 = vadd.s32 (!%p515_p8), 32, %v330_v56  ;;  %vm347_vm0 = vcmp.lt.s32.totalorder (!%p515_p8), %v339_v0, 16  ;;  %v340_v11 = vadd.s32 (!%p515_p8), %v674_v52, %v331_v1  ;;  %v375_v15 = vsub.f32 (!%p515_p8), %v359_v4, %v367_v5  ;;  %v369_v27 = vld [vmem:[%s634_s28 + $0x30] sm:$0xff] (!%p515_p8)  ;;  %v362_v30 = vld [vmem:[%s629_s25 + $0x38] sm:$0xff] (!%p515_p8)  ;;  %v384_v46 = vld [vmem:[%s616_s21 + $0x28] sm:$0xff] (!%p515_p8) }
  0x2e   : > { %v341_v13 = vadd.s32 (!%p515_p8), %v674_v52, %v332_v3  ;;  %v395_v16 = vsel (!%p515_p8), %vm347_vm0, %v387_v60, 0.0  ;;  %v342_v17 = vadd.s32 (!%p515_p8), %v674_v52, %v333_v8  ;;  %v390_v19 = vmul.f32 (!%p515_p8), %v374_v9, %v374_v9  ;;  %v370_v31 = vld [vmem:[%s634_s28 + $0x38] sm:$0xff] (!%p515_p8)  ;;  %v385_v51 = vld [vmem:[%s616_s21 + $0x30] sm:$0xff] (!%p515_p8) }
  0x2f   : > { %v343_v20 = vadd.s32 %v674_v52, %v334_v10  ;;  %v411_v23 = vadd.f32 %v395_v16, %v379_v6  ;;  %vm348_vm1 = vcmp.lt.s32.totalorder %v340_v11, 16  ;;  %v391_v24 = vmul.f32 %v375_v15, %v375_v15  ;;  %v386_v53 = vld [vmem:[%s616_s21 + $0x38] sm:$0xff] }
  0x30   : > { %vm349_vm2 = vcmp.lt.s32.totalorder %v341_v13, 16  ;;  %v396_v28 = vsel %vm348_vm1, %v388_v2, 0.0  ;;  %vm350_vm3 = vcmp.lt.s32.totalorder %v342_v17, 16  ;;  %v335_v38 = vadd.s32 40, %v330_v56 }
  0x31   : > { %v397_v29 = vsel %vm349_vm2, %v389_v7, 0.0  ;;  %vm351_vm4 = vcmp.lt.s32.totalorder %v343_v20, 16  ;;  %419 = vst [vmem:[%s616_s21] sm:$0xff] %v411_v23  ;;  %v412_v32 = vadd.f32 %v396_v28, %v380_v12  ;;  %v398_v34 = vsel %vm350_vm3, %v390_v19, 0.0 }
  0x32   : > { %v413_v33 = vadd.f32 %v397_v29, %v381_v14  ;;  %v399_v35 = vsel %vm351_vm4, %v391_v24, 0.0  ;;  %v414_v36 = vadd.f32 %v398_v34, %v382_v18  ;;  %v376_v39 = vsub.f32 %v360_v22, %v368_v25 }
  0x33   : > { %v415_v37 = vadd.f32 %v399_v35, %v383_v21  ;;  %420 = vst [vmem:[%s616_s21 + $0x8] sm:$0xff] %v412_v32  ;;  %v336_v40 = vadd.s32 48, %v330_v56  ;;  %v377_v41 = vsub.f32 %v361_v26, %v369_v27  ;;  %v337_v42 = vadd.s32 56, %v330_v56 }
  0x34   : > { %421 = vst [vmem:[%s616_s21 + $0x10] sm:$0xff] %v413_v33  ;;  %v378_v43 = vsub.f32 %v362_v30, %v370_v31  ;;  %422 = vst [vmem:[%s616_s21 + $0x18] sm:$0xff] %v414_v36  ;;  %v344_v44 = vadd.s32 %v674_v52, %v335_v38  ;;  %v392_v45 = vmul.f32 %v376_v39, %v376_v39 }
  0x35   : > { %423 = vst [vmem:[%s616_s21 + $0x20] sm:$0xff] %v415_v37  ;;  %v345_v47 = vadd.s32 %v674_v52, %v336_v40  ;;  %v393_v48 = vmul.f32 %v377_v41, %v377_v41  ;;  %v346_v49 = vadd.s32 %v674_v52, %v337_v42 }
  0x36   : > { %v394_v50 = vmul.f32 %v378_v43, %v378_v43  ;;  %vm352_vm5 = vcmp.lt.s32.totalorder %v344_v44, 16 }
  0x37   : > { %v400_v54 = vsel %vm352_vm5, %v392_v45, 0.0  ;;  %vm353_vm6 = vcmp.lt.s32.totalorder %v345_v47, 16  ;;  %vm354_vm7 = vcmp.lt.s32.totalorder %v346_v49, 16 }
  0x38   : > { %v416_v55 = vadd.f32 %v400_v54, %v384_v46  ;;  %v401_v56 = vsel %vm353_vm6, %v393_v48, 0.0  ;;  %v402_v57 = vsel %vm354_vm7, %v394_v50, 0.0 }
  0x39   : > { %v417_v58 = vadd.f32 %v401_v56, %v385_v51  ;;  %v418_v59 = vadd.f32 %v402_v57, %v386_v53 }
  0x3a   : > { %424 = vst [vmem:[%s616_s21 + $0x28] sm:$0xff] %v416_v55 }
  0x3b   : > { %425 = vst [vmem:[%s616_s21 + $0x30] sm:$0xff] %v417_v58  ;;  %426 = vst [vmem:[%s616_s21 + $0x38] sm:$0xff] %v418_v59 }
  0x3c PF: > { %s12_s11 = sadd.s32 1, %s566_s11   ;;  %s726_s9 = smov %s562_s10 }
  0x3d   : > { %p9_p9 = scmp.ge.s32.totalorder %s12_s11, 4   ;;  %s727_s10 = smov %s729_s12 }
  0x3f   :  { %11 = sbr.rel (!%p9_p9) target bundleno = 2 (0x2), region = 73 }

</bundles_post_ra>
